<compile_context>
chip_gen: v6e
topology: v6e:2x2x1
jax: 0.10.0
libtpu: 0.0.40
codegen_flags: <defaults>
</compile_context>

<pallas_src>
import jax
import jax.numpy as jnp
from jax.experimental import pallas as pl
from jax.experimental.pallas import tpu as pltpu

N_PROJ = 2    # module default n=2 (number of top projections; -1 -> use C)
P_NORM = 1    # module default p=1 (torch.norm(Jv, 1) == sum(|Jv|)); only p=1 implemented
MAX_TS = 512  # 512*128*4 B = 256 KiB per gathered f32 block


def _pjacobi_gather_kernel(idx_ref, wt_ref, out_ref, row_acc):
    # idx_ref : (B, n) int32 in SMEM  -- scalar-prefetched top-n column indices
    # wt_ref  : (1, TS, 128)          -- gathered chunk of row idx_ref[b, ii] of W^T
    # out_ref : (1, TS, 128) f32      -- per-d-tile partial sum of |Jv| (lane-dense)
    # row_acc : (1, TS, 128) f32 VMEM -- accumulates the n chunks of one batch row
    b = pl.program_id(1)
    ii = pl.program_id(2)
    n_last = pl.num_programs(2) - 1

    chunk = wt_ref[...].astype(jnp.float32)

    @pl.when(ii == 0)
    def _():
        row_acc[...] = chunk

    @pl.when(ii > 0)
    def _():
        row_acc[...] = row_acc[...] + chunk

    @pl.when(jnp.logical_and(b == 0, ii == 0))
    def _():
        out_ref[...] = jnp.zeros_like(out_ref)

    @pl.when(ii == n_last)
    def _():
        # p=1 norm contribution of this batch row for this D tile: abs AFTER the
        # sum over the n selected columns, accumulated elementwise (no XLU here).
        out_ref[...] = out_ref[...] + jnp.abs(row_acc[...])


def _largest_divisor_leq(n, cap):
    for t in range(min(n, cap), 0, -1):
        if n % t == 0:
            return t
    return 1


@jax.jit
def pjacobi_norm_reg(y, w):
    """J2 = ||(dy/dx)^T v||_1 / (n*B) for the linear model y = x_flat @ w + bias."""
    B, C = y.shape
    D, C2 = w.shape
    assert C == C2
    # TODO(synk): pad D up to a multiple of 128 for general feature sizes.
    assert D % 128 == 0, "D must be lane-aligned (multiple of 128)"

    n = C if N_PROJ == -1 else N_PROJ

    # Top-n column indices == argsort(y, descending)[:, :n].  (Tie-break may
    # differ from torch's unstable sort on exactly-equal logits.)
    _, idx = jax.lax.top_k(y, n)
    idx = idx.astype(jnp.int32)                      # (B, n) -> SMEM prefetch

    n_sub = D // 128
    ts = _largest_divisor_leq(n_sub, MAX_TS)
    n_d_tiles = n_sub // ts

    # Lane-dense W^T: (C, D//128, 128).  Layout plumbing only (a real model
    # would store weights transposed; storing them in bf16 would further halve
    # HBM traffic — the kernel casts to f32 after load either way).
    wt3 = w.T.reshape(C, n_sub, 128)

    partials = pl.pallas_call(
        _pjacobi_gather_kernel,
        out_shape=jax.ShapeDtypeStruct((n_d_tiles, ts, 128), jnp.float32),
        grid_spec=pltpu.PrefetchScalarGridSpec(
            num_scalar_prefetch=1,
            grid=(n_d_tiles, B, n),
            in_specs=[
                # Gather only the needed rows of W^T: block index for axis 0
                # comes from the prefetched top-n index table.
                pl.BlockSpec((1, ts, 128),
                             lambda d, b, ii, idx_ref: (idx_ref[b, ii], d, 0)),
            ],
            out_specs=pl.BlockSpec((1, ts, 128),
                                   lambda d, b, ii, idx_ref: (d, 0, 0)),
            scratch_shapes=[pltpu.VMEM((1, ts, 128), jnp.float32)],
        ),
        compiler_params=pltpu.CompilerParams(
            dimension_semantics=("parallel", "arbitrary", "arbitrary")),
    )(idx, wt3)

    # Final (tiny) cross-lane reduce + scale outside the kernel.
    return jnp.sum(partials) / jnp.float32(n * B)


if __name__ == "__main__":
    key = jax.random.PRNGKey(0)
    kx, kw, kb = jax.random.split(key, 3)

    B, C_in, H, W_sp = 2, 4, 16, 16      # x is NCHW
    C_out = 8
    D = C_in * H * W_sp

    x = jax.random.normal(kx, (B, C_in, H, W_sp), dtype=jnp.float32)
    w = jax.random.normal(kw, (D, C_out), dtype=jnp.float32) * 0.05
    bias = jax.random.normal(kb, (C_out,), dtype=jnp.float32) * 0.05

    # Synthetic model forward (plain-JAX glue): y = f(x)
    def model(xx):
        return xx.reshape(B, D) @ w + bias

    y = model(x)

    # Pallas kernel: J2 = ||(dy/dx)^T v||_1 / (n * B)
    j2 = pjacobi_norm_reg(y, w)
    jax.block_until_ready(j2)

    # Reference in plain JAX (argsort + jax.vjp) to sanity-check semantics.
    idx_ref = jnp.argsort(-y, axis=1)
    v_ref = jnp.sum(
        jax.nn.one_hot(idx_ref[:, :N_PROJ], C_out, dtype=jnp.float32), axis=1)
    _, vjp_fn = jax.vjp(model, x)
    (jv_ref,) = vjp_fn(v_ref)
    ref = jnp.sum(jnp.abs(jv_ref)) / (N_PROJ * B)

    assert abs(float(j2) - float(ref)) <= 1e-3 * max(1.0, abs(float(ref))), (
        float(j2), float(ref))

    print("KERNEL_OK")
</pallas_src>

<mosaic_0001>
module attributes {stable_mosaic.version = 11 : i64} {
  func.func @_pjacobi_gather_kernel(%arg0: i32, %arg1: i32, %arg2: i32, %arg3: memref<2x2xi32, #tpu.memory_space<smem>>, %arg4: memref<1x8x128xf32, #tpu.memory_space<vmem>>, %arg5: memref<1x8x128xf32, #tpu.memory_space<vmem>>, %arg6: memref<1x8x128xf32, #tpu.memory_space<vmem>>) attributes {dimension_semantics = [#tpu.dimension_semantics<parallel>, #tpu.dimension_semantics<arbitrary>, #tpu.dimension_semantics<arbitrary>], iteration_bounds = array<i64: 1, 2, 2>, scalar_prefetch = 1 : i64, scratch_operands = 1 : i64, tpu.core_type = #tpu.core_type<tc>, window_params = [{transform_indices = @transform_0, window_bounds = array<i64: 1, 8, 128>}, {transform_indices = @transform_1, window_bounds = array<i64: 1, 8, 128>}]} {
    %c0 = arith.constant 0 : index
    %c0_0 = arith.constant 0 : index
    %c0_1 = arith.constant 0 : index
    %0 = vector.load %arg4[%c0, %c0_0, %c0_1] : memref<1x8x128xf32, #tpu.memory_space<vmem>>, vector<1x8x128xf32>
    %c0_i32 = arith.constant 0 : i32
    %1 = arith.cmpi eq, %arg2, %c0_i32 : i32
    %2 = arith.extui %1 : i1 to i32
    %c0_i32_2 = arith.constant 0 : i32
    %3 = arith.cmpi ne, %2, %c0_i32_2 : i32
    scf.if %3 {
      %c0_9 = arith.constant 0 : index
      %c0_10 = arith.constant 0 : index
      %c0_11 = arith.constant 0 : index
      %15 = vector.load %arg6[%c0_9, %c0_10, %c0_11] : memref<1x8x128xf32, #tpu.memory_space<vmem>>, vector<1x8x128xf32>
      tpu.vector_store %arg6[%c0_9, %c0_10, %c0_11], %0 {strides = array<i32>} : memref<1x8x128xf32, #tpu.memory_space<vmem>>, vector<1x8x128xf32>,
    } else {
    }
    %c0_i32_3 = arith.constant 0 : i32
    %4 = arith.cmpi sgt, %arg2, %c0_i32_3 : i32
    %5 = arith.extui %4 : i1 to i32
    %c0_i32_4 = arith.constant 0 : i32
    %6 = arith.cmpi ne, %5, %c0_i32_4 : i32
    scf.if %6 {
      %c0_9 = arith.constant 0 : index
      %c0_10 = arith.constant 0 : index
      %c0_11 = arith.constant 0 : index
      %15 = vector.load %arg6[%c0_9, %c0_10, %c0_11] : memref<1x8x128xf32, #tpu.memory_space<vmem>>, vector<1x8x128xf32>
      %16 = arith.addf %15, %0 : vector<1x8x128xf32>
      %c0_12 = arith.constant 0 : index
      %c0_13 = arith.constant 0 : index
      %c0_14 = arith.constant 0 : index
      %17 = vector.load %arg6[%c0_12, %c0_13, %c0_14] : memref<1x8x128xf32, #tpu.memory_space<vmem>>, vector<1x8x128xf32>
      tpu.vector_store %arg6[%c0_12, %c0_13, %c0_14], %16 {strides = array<i32>} : memref<1x8x128xf32, #tpu.memory_space<vmem>>, vector<1x8x128xf32>,
    } else {
    }
    %c0_i32_5 = arith.constant 0 : i32
    %7 = arith.cmpi eq, %arg1, %c0_i32_5 : i32
    %c0_i32_6 = arith.constant 0 : i32
    %8 = arith.cmpi eq, %arg2, %c0_i32_6 : i32
    %9 = arith.andi %7, %8 : i1
    %10 = arith.extui %9 : i1 to i32
    %c0_i32_7 = arith.constant 0 : i32
    %11 = arith.cmpi ne, %10, %c0_i32_7 : i32
    scf.if %11 {
      %cst = arith.constant 0.000000e+00 : f32
      %15 = vector.broadcast %cst : f32 to vector<1x8x128xf32>
      %c0_9 = arith.constant 0 : index
      %c0_10 = arith.constant 0 : index
      %c0_11 = arith.constant 0 : index
      %16 = vector.load %arg5[%c0_9, %c0_10, %c0_11] : memref<1x8x128xf32, #tpu.memory_space<vmem>>, vector<1x8x128xf32>
      tpu.vector_store %arg5[%c0_9, %c0_10, %c0_11], %15 {strides = array<i32>} : memref<1x8x128xf32, #tpu.memory_space<vmem>>, vector<1x8x128xf32>,
    } else {
    }
    %c1_i32 = arith.constant 1 : i32
    %12 = arith.cmpi eq, %arg2, %c1_i32 : i32
    %13 = arith.extui %12 : i1 to i32
    %c0_i32_8 = arith.constant 0 : i32
    %14 = arith.cmpi ne, %13, %c0_i32_8 : i32
    scf.if %14 {
      %c0_9 = arith.constant 0 : index
      %c0_10 = arith.constant 0 : index
      %c0_11 = arith.constant 0 : index
      %15 = vector.load %arg5[%c0_9, %c0_10, %c0_11] : memref<1x8x128xf32, #tpu.memory_space<vmem>>, vector<1x8x128xf32>
      %c0_12 = arith.constant 0 : index
      %c0_13 = arith.constant 0 : index
      %c0_14 = arith.constant 0 : index
      %16 = vector.load %arg6[%c0_12, %c0_13, %c0_14] : memref<1x8x128xf32, #tpu.memory_space<vmem>>, vector<1x8x128xf32>
      %17 = math.absf %16 : vector<1x8x128xf32>
      %18 = arith.addf %15, %17 : vector<1x8x128xf32>
      %c0_15 = arith.constant 0 : index
      %c0_16 = arith.constant 0 : index
      %c0_17 = arith.constant 0 : index
      %19 = vector.load %arg5[%c0_15, %c0_16, %c0_17] : memref<1x8x128xf32, #tpu.memory_space<vmem>>, vector<1x8x128xf32>
      tpu.vector_store %arg5[%c0_15, %c0_16, %c0_17], %18 {strides = array<i32>} : memref<1x8x128xf32, #tpu.memory_space<vmem>>, vector<1x8x128xf32>,
    } else {
    }
    return
  }
  func.func @transform_0(%arg0: i32, %arg1: i32, %arg2: i32, %arg3: memref<2x2xi32, #tpu.memory_space<smem>>) -> (i32, i32, i32) {
    %0 = arith.index_cast %arg1 : i32 to index
    %1 = arith.index_cast %arg2 : i32 to index
    %2 = memref.load %arg3[%0, %1] : memref<2x2xi32, #tpu.memory_space<smem>>
    %c0_i32 = arith.constant 0 : i32
    %c0_i32_0 = arith.constant 0 : i32
    return %2, %arg0, %c0_i32 : i32, i32, i32
  }
  func.func @transform_1(%arg0: i32, %arg1: i32, %arg2: i32, %arg3: memref<2x2xi32, #tpu.memory_space<smem>>) -> (i32, i32, i32) {
    %c0_i32 = arith.constant 0 : i32
    %c0_i32_0 = arith.constant 0 : i32
    %c0_i32_1 = arith.constant 0 : i32
    return %arg0, %c0_i32, %c0_i32_0 : i32, i32, i32
  }
}

</mosaic_0001>

<bundles_post_ra>
// kernel: pjacobi_norm_reg.1
= control target key start
LH: loop header
LB: loop body
LE: loop exit
PB: predicated region body
PF: predicated region fallthrough
CT: control target
= control target key end

     0   :  { %s502_s0 = inlined_call_operand.vmem [shape: s32[2,2], index: 0, kind: input, shape index: {}]   ;;  %s503_s1 = inlined_call_operand.vmem [shape: f32[8,8,128], index: 1, kind: input, shape index: {}]   ;;  %s504_s2 = inlined_call_operand.vmem [shape: f32[1,8,128], index: 2, kind: output, shape index: {}]  }
   0x1   :  { %s7_s11 = sshll.u32 %s502_s0, 4  ;;  %s8_s11 = int_to_ptr.vmem [resolvable:$true] %s7_s11 }
   0x2   :  { %s357_s12 = scalar_lea.vmem %s8_s11, 32  ;;  %p362_p1 = scmp.lt.s32.totalorder %s8_s11, %s8_s11 }
   0x3   :  { %p358_p0 = scmp.ne.s32.totalorder %s8_s11, %s357_s12  ;;  %p363_p2 = scmp.lt.s32.totalorder %s357_s12, %s357_s12 }
   0x5   :  { %p364_p3 = por %p363_p2, %p362_p1 }
   0x7   :  { %p365_p4 = pnand %p364_p3, %p358_p0 }
   0x9   :  { %368 = shalt.err (!%p365_p4)  }
   0xa   :  { %s411_s13 = smov [#allocation4]  }
   0xb   :  { %10 = dma.vmem_to_smem %s8_s11, 32, %s411_s13, [#allocation3] }
   0xc   :  { %389 = dma.done.wait [#allocation3], 32 }
   0xd   :  { %390 = vsyncadd [#allocation3], 4294967264 }
   0xe   :  { %12 = sfence }
   0xf   :  { %s431_s14 = smov 0   ;;  %s433_s15 = smov 0  }
  0x10   :  { %s435_s16 = smov 0   ;;  %s437_s0 = smov 0  }
  0x11   :  { %s439_s17 = smov 0  }
  0x12 LB: > { %s30_s18 = sadd.s32 1, %s401_s16  ;;  %s33_s19 = sadd.s32 1, %s405_s0  ;;  %s409_s17 = sphi %s439_s17, %s18_s17   ;;  %s405_s0 = sphi %s437_s0, %s508_s0   ;;  %s401_s16 = sphi %s435_s16, %s507_s16   ;;  %s397_s15 = sphi %s433_s15, %s506_s15   ;;  %s393_s14 = sphi %s431_s14, %s505_s14  }
  0x13   : > { %p31_p5 = scmp.ge.s32.totalorder %s30_s18, 2  ;;  %p306_p6 = scmp.ge.s32.totalorder %s409_s17, 1 }
  0x14   : > { %p149_p7 = scmp.lt.s32.totalorder %s409_s17, 5 }
  0x15   : > { %s510_s18 = smov (%p31_p5, %s30_s18), 0  ;;  %s512_s19 = smov (!%p31_p5, %s33_s19), %s405_s0 }
  0x16   : > { %p150_p8 = pnand %p306_p6, %p149_p7  ;;  %p35_p9 = scmp.ge.s32.totalorder %s512_s19, 2 }
  0x17   : > { %s178_s20 = sshra.s32 (!%p150_p8), %s393_s14, 7  ;;  %s183_s21 = sand.u32 (!%p150_p8), 127, %s393_s14 }
  0x18   : > { %s514_s19 = smov (%p35_p9, %s512_s19), 0  ;;  %153 = sbr.rel (%p150_p8) target bundleno = 77 (0x4d), region = 24 }
  0x19   : > { %s180_s22 = sadd.s32 (!%p150_p8), %s397_s15, %s178_s20  ;;  %p206_p10 = scmp.eq.s32.totalorder (!%p150_p8), %s393_s14, 0 }
  0x1a   : > { %s307_s23 = sshll.u32 (!%p150_p8), %s180_s22, 7  ;;  %p309_p12 = scmp.ne.s32.totalorder (!%p150_p8), %s393_s14, 0 }
  0x1b   : > { %s184_s24 = sadd.s32 (!%p150_p8), %s307_s23, %s183_s21 }
  0x1c   : > { %s185_s25 = sld [smem:[#allocation4 + %s184_s24]] (!%p150_p8) }
  0x22   : > { %p186_p11 = scmp.lt.s32.totalorder %s185_s25, 7 }
  0x23   : > { %209 = sbr.rel (%p309_p12) target bundleno = 41 (0x29), region = 28 }
  0x24   : > { %s516_s25 = smov (!%p186_p11, %s185_s25), 7 }
  0x25   : > { %s308_s26 = sshll.u32 %s516_s25, 3 }
  0x26   : > { %s192_s29 = scalar_lea.vmem %s503_s1, %s308_s26 }
  0x27   : > { %v205_v0 = vld [vmem:[%s192_s29] sm:$0xff] }
  0x28   : > { %210 = vst [vmem:[#allocation2] sm:$0xff] %v205_v0 }
  0x29 PF: > { %p310_p13 = scmp.le.s32.totalorder %s393_s14, 0 }
  0x2b   : > { %214 = sbr.rel (%p310_p13) target bundleno = 52 (0x34), region = 32 }
  0x30   : > { %v215_v1 = vld [vmem:[#allocation2] sm:$0xff] }
  0x31   : > { %v216_v2 = vadd.f32 %v215_v1, %v205_v0 }
  0x33   : > { %217 = vst [vmem:[#allocation2] sm:$0xff] %v216_v2 }
  0x34 PF: > { %p218_p0 = scmp.eq.s32.totalorder %s397_s15, 0 }
  0x36   : > { %p219_p1 = pnand %p218_p0, %p206_p10 }
  0x38   : > { %222 = sbr.rel (%p219_p1) target bundleno = 63 (0x3f), region = 36 }
  0x3d   : > { %v412_v3 = vmov 0.0  }
  0x3e   : > { %223 = vst [vmem:[%s504_s2] sm:$0xff] %v412_v3 }
  0x3f PF: > { %p311_p2 = scmp.ne.s32.totalorder %s393_s14, 1 }
  0x41   : > { %227 = sbr.rel (%p311_p2) target bundleno = 77 (0x4d), region = 40 }
  0x46   : > { %v228_v4 = vld [vmem:[%s504_s2] sm:$0xff] }
  0x47   : > { %v229_v5 = vld [vmem:[#allocation2] sm:$0xff] }
  0x48   : > { %v230_v6 = vand.u32 2147483647, %v229_v5 }
  0x4a   : > { %v231_v7 = vadd.f32 %v230_v6, %v228_v4 }
  0x4c   : > { %232 = vst [vmem:[%s504_s2] sm:$0xff] %v231_v7 }
  0x4d PF: > { %s18_s17 = sadd.s32 1, %s409_s17   ;;  %s505_s14 = smov %s401_s16 }
  0x4e   : > { %p15_p3 = scmp.ge.s32.totalorder %s18_s17, 6   ;;  %s506_s15 = smov %s405_s0 }
  0x4f   : > { %s507_s16 = smov %s510_s18  ;;  %s508_s0 = smov %s514_s19 }
  0x50   :  { %17 = sbr.rel (!%p15_p3) target bundleno = 18 (0x12), region = 70 }

</bundles_post_ra>
